<compile_context>
chip_gen: v6e
topology: v6e:2x2x1
jax: 0.10.0
libtpu: 0.0.40
codegen_flags: <defaults>
</compile_context>

<pallas_src>
import functools
import math

import jax
import jax.numpy as jnp
from jax.experimental import pallas as pl
from jax.experimental.pallas import tpu as pltpu

_LANE = 128      # vreg lane width: hidden activation dims padded to this
_SUBLANE = 8     # vreg sublane width: batch tile rounded to this


def _round_up(x, m):
    return ((x + m - 1) // m) * m


def _apply_activation(h, activation):
    if activation == "relu":
        return jnp.maximum(h, 0.0)
    if activation == "tanh":
        return jnp.tanh(h)
    if activation == "sigmoid":
        return jax.nn.sigmoid(h)
    return h  # 'null' / None -> identity


# ----------------------------- Pallas kernel --------------------------------
def _fused_mlp_kernel(x_ref, *refs, num_layers, activation, n_pads):
    """Whole MLP for one batch tile; hidden activations never leave VMEM.

    refs = (w_0, ..., w_{L-1}, b_stack, o_ref)
      w_i     : (K_i, N_pad_i)  param dtype (bf16 by default)
      b_stack : (L, N_max)      f32, row i holds layer-i bias (zero padded)
      o_ref   : (tm, n_out)     true output width (masked vst, few bytes)
    """
    o_ref = refs[-1]
    b_stack = refs[-2][...]            # (L, N_max) f32, resident
    w_refs = refs[:num_layers]

    h = x_ref[...]                     # (tm, K) f32
    for i in range(num_layers):
        w = w_refs[i][...]             # (K_i, N_pad_i), pre-transposed
        b = b_stack[i:i + 1, :n_pads[i]]            # (1, N_pad_i) f32
        # bf16 operands on the MXU, f32 accumulation; bias/activation in f32.
        h = jnp.dot(h.astype(w.dtype), w,
                    preferred_element_type=jnp.float32) + b
        if i < num_layers - 1:
            h = _apply_activation(h, activation)
        # nn.Dropout(p=0.2) in eval mode == identity.
        # TODO(synk): training-mode dropout would need pltpu.prng_seed /
        # pltpu.prng_random_bits inside the kernel.
    o_ref[...] = h.astype(o_ref.dtype)


# --------------------------- parameter handling ------------------------------
def init_mlp_params(key, units, init_type="default"):
    """Deterministic init mirroring nn.Linear shapes.

    Returns list of (W_t, b) with W_t of shape (in, out) -- unpadded, used for
    the pure-JAX reference and as the source for kernel packing."""
    params = []
    for level in range(len(units) - 1):
        fan_in, fan_out = units[level], units[level + 1]
        key, kw, kb = jax.random.split(key, 3)
        if init_type == "uniform":
            w = jax.random.uniform(kw, (fan_out, fan_in), jnp.float32, 0.0, 1.0)
            b = jax.random.uniform(kb, (fan_out,), jnp.float32, 0.0, 1.0)
        elif init_type == "normal":
            w = jax.random.normal(kw, (fan_out, fan_in), jnp.float32)
            b = jax.random.normal(kb, (fan_out,), jnp.float32)
        elif init_type == "zero":
            w = jnp.zeros((fan_out, fan_in), jnp.float32)
            b = jnp.zeros((fan_out,), jnp.float32)
        else:  # 'default' -> PyTorch default: U(-1/sqrt(fan_in), 1/sqrt(fan_in))
            bound = 1.0 / math.sqrt(fan_in)
            w = jax.random.uniform(kw, (fan_out, fan_in), jnp.float32, -bound, bound)
            b = jax.random.uniform(kb, (fan_out,), jnp.float32, -bound, bound)
        params.append((w.T, b))  # store pre-transposed (in, out)
    return params


def pack_mlp_params(params, param_dtype=jnp.bfloat16):
    """One-time layout prep (hoisted out of the forward path).

    Padding policy (per perf review):
      * input feature dim (dims[0]) is NOT padded (full-extent block),
      * hidden activation dims are padded to 128 lanes,
      * the final output dim is NOT padded (true-width store).
    All padded weight rows/cols and bias entries are EXACTLY zero -- this is
    the invariant that neutralizes activation(0) in padded hidden lanes.

    Returns (w_packed, b_stack, dims, n_pads)."""
    dims = [params[0][0].shape[0]] + [w_t.shape[1] for w_t, _ in params]
    num_layers = len(params)

    n_pads = []
    for li in range(num_layers):
        n = dims[li + 1]
        n_pads.append(n if li == num_layers - 1 else _round_up(n, _LANE))
    k_pads = [dims[0]] + n_pads[:-1]
    n_max = max(n_pads)

    w_packed = []
    b_stack = jnp.zeros((num_layers, n_max), jnp.float32)
    for li, (w_t, b) in enumerate(params):
        k, n = w_t.shape
        kp, npd = k_pads[li], n_pads[li]
        w_pad = jnp.zeros((kp, npd), jnp.float32).at[:k, :n].set(w_t)
        w_packed.append(w_pad.astype(param_dtype))
        b_stack = b_stack.at[li, :n].set(b)
    return w_packed, b_stack, dims, n_pads


# ------------------------------ fused forward ---------------------------------
def mlp_forward_fused(x, w_packed, b_stack, dims, n_pads,
                      hidden_layer_activation="relu", block_m=512):
    """Single pallas_call for the whole MLP, tiled over the batch dim."""
    B, K = x.shape
    assert K == dims[0]
    num_layers = len(w_packed)
    n_out = dims[-1]

    # Batch tiling:
    #  * tiny batches (<=16): one sublane-rounded tile,
    #  * otherwise: at least 2 grid steps (so v7x's 2 TCs both get work),
    #    capped at block_m (512 default; big tiles amortize per-step overhead).
    if B <= 2 * _SUBLANE:
        tm = _round_up(B, _SUBLANE)
    else:
        tm = min(block_m, _round_up(-(-B // 2), _SUBLANE))
    b_padded = _round_up(B, tm)
    x_in = x if b_padded == B else jnp.pad(x, ((0, b_padded - B), (0, 0)))

    in_specs = [pl.BlockSpec((tm, K), lambda i: (i, 0))]
    for w in w_packed:
        # Resident across the grid (constant index map).  NOTE(v7x scaling):
        # switch to pipeline_mode=pl.Buffered(1) / scratch DMA-once when the
        # hidden dims grow enough for double-buffered params to pressure VMEM.
        in_specs.append(pl.BlockSpec(w.shape, lambda i: (0, 0)))
    in_specs.append(pl.BlockSpec(b_stack.shape, lambda i: (0, 0)))

    act = None if hidden_layer_activation == "null" else hidden_layer_activation

    # Advisory cost estimate from TRUE (unpadded) dims.
    pbytes = jnp.dtype(w_packed[0].dtype).itemsize
    flops = sum(2 * B * di * do for di, do in zip(dims[:-1], dims[1:]))
    transcendentals = (sum(B * d for d in dims[1:-1])
                       if act in ("tanh", "sigmoid") else 0)
    bytes_accessed = (4 * B * K
                      + pbytes * sum(di * do for di, do in zip(dims[:-1], dims[1:]))
                      + 4 * sum(dims[1:])
                      + 4 * B * n_out)

    kernel = functools.partial(_fused_mlp_kernel, num_layers=num_layers,
                               activation=act, n_pads=tuple(n_pads))

    out = pl.pallas_call(
        kernel,
        out_shape=jax.ShapeDtypeStruct((b_padded, n_out), x.dtype),
        grid=(b_padded // tm,),
        in_specs=in_specs,
        out_specs=pl.BlockSpec((tm, n_out), lambda i: (i, 0)),
        compiler_params=pltpu.CompilerParams(
            dimension_semantics=("parallel",),      # megacore-shardable
            vmem_limit_bytes=32 * 1024 * 1024,      # safe on v5e/v6e/v7x
        ),
        cost_estimate=pl.CostEstimate(
            flops=flops,
            transcendentals=transcendentals,
            bytes_accessed=bytes_accessed,
        ),
    )(x_in, *w_packed, b_stack)
    return out if b_padded == B else out[:B]


# ------------------------------ reference -------------------------------------
def mlp_forward_ref(x, params, hidden_layer_activation="relu",
                    compute_dtype=None):
    """Pure-JAX reference.  compute_dtype=bf16 mimics the kernel's mixed
    precision (bf16 operands, f32 accumulation, f32 bias/activation)."""
    act = None if hidden_layer_activation == "null" else hidden_layer_activation
    n_layers = len(params)
    h = x
    for i, (w_t, b) in enumerate(params):
        if compute_dtype is not None:
            h = jnp.dot(h.astype(compute_dtype), w_t.astype(compute_dtype),
                        preferred_element_type=jnp.float32) + b
        else:
            h = h @ w_t + b
        if i < n_layers - 1:
            h = _apply_activation(h, act)
    return h


# --------------------------------- main ---------------------------------------
if __name__ == "__main__":
    key = jax.random.PRNGKey(0)
    units = [32, 64, 64, 8]          # MLP(units=[32, 64, 64, 8])
    batch = 8

    kparams, kx = jax.random.split(key)
    params = init_mlp_params(kparams, units, init_type="default")
    x = jax.random.normal(kx, (batch, units[0]), jnp.float32)

    # One-time layout prep (transpose done at init; pad hidden dims, bf16 cast).
    w_packed, b_stack, dims, n_pads = pack_mlp_params(
        params, param_dtype=jnp.bfloat16)

    out = mlp_forward_fused(x, w_packed, b_stack, dims, n_pads,
                            hidden_layer_activation="relu")
    out = jax.block_until_ready(out)
    assert out.shape == (batch, units[-1])

    # Tight check vs. a bf16-matmul / f32-accumulate reference (same precision
    # recipe as the kernel), plus a looser sanity check vs. the pure-f32 math.
    ref_bf16 = mlp_forward_ref(x, params, "relu", compute_dtype=jnp.bfloat16)
    assert jnp.allclose(out, ref_bf16, atol=2e-3, rtol=2e-3), \
        "mismatch vs bf16 reference"
    ref_f32 = mlp_forward_ref(x, params, "relu")
    assert jnp.allclose(out, ref_f32, atol=5e-2, rtol=5e-2), \
        "mismatch vs f32 reference"

    print("KERNEL_OK")
</pallas_src>

<mosaic_0001>
module attributes {stable_mosaic.version = 11 : i64} {
  func.func @_fused_mlp_kernel(%arg0: i32, %arg1: memref<8x32xf32, #tpu.memory_space<vmem>>, %arg2: memref<32x128xbf16, #tpu.memory_space<vmem>>, %arg3: memref<128x128xbf16, #tpu.memory_space<vmem>>, %arg4: memref<128x8xbf16, #tpu.memory_space<vmem>>, %arg5: memref<3x128xf32, #tpu.memory_space<vmem>>, %arg6: memref<8x8xf32, #tpu.memory_space<vmem>>) attributes {dimension_semantics = [#tpu.dimension_semantics<parallel>], iteration_bounds = array<i64: 1>, scalar_prefetch = 0 : i64, scratch_operands = 0 : i64, tpu.core_type = #tpu.core_type<tc>, window_params = [{transform_indices = @transform_0, window_bounds = array<i64: 8, 32>}, {pipeline_mode = #tpu.pipeline_mode<synchronous>, transform_indices = @transform_1, window_bounds = array<i64: 32, 128>}, {pipeline_mode = #tpu.pipeline_mode<synchronous>, transform_indices = @transform_2, window_bounds = array<i64: 128, 128>}, {pipeline_mode = #tpu.pipeline_mode<synchronous>, transform_indices = @transform_3, window_bounds = array<i64: 128, 8>}, {pipeline_mode = #tpu.pipeline_mode<synchronous>, transform_indices = @transform_4, window_bounds = array<i64: 3, 128>}, {transform_indices = @transform_5, window_bounds = array<i64: 8, 8>}]} {
    %c0 = arith.constant 0 : index
    %c0_0 = arith.constant 0 : index
    %0 = vector.load %arg5[%c0, %c0_0] : memref<3x128xf32, #tpu.memory_space<vmem>>, vector<3x128xf32>
    %c0_1 = arith.constant 0 : index
    %c0_2 = arith.constant 0 : index
    %1 = vector.load %arg1[%c0_1, %c0_2] : memref<8x32xf32, #tpu.memory_space<vmem>>, vector<8x32xf32>
    %c0_3 = arith.constant 0 : index
    %c0_4 = arith.constant 0 : index
    %2 = vector.load %arg2[%c0_3, %c0_4] : memref<32x128xbf16, #tpu.memory_space<vmem>>, vector<32x128xbf16>
    %3 = vector.extract_strided_slice %0 {offsets = [0, 0], sizes = [1, 128], strides = [1, 1]} : vector<3x128xf32> to vector<1x128xf32>
    %4 = arith.truncf %1 : vector<8x32xf32> to vector<8x32xbf16>
    %cst = arith.constant dense<0.000000e+00> : vector<8x128xf32>
    %5 = tpu.matmul %4, %2, %cst {dimension_numbers = #tpu.dot_dimension_numbers<[1], [0], [0], [1], [0, 0, 1, 1], [], []>} : vector<8x32xbf16>, vector<32x128xbf16>, vector<8x128xf32> -> vector<8x128xf32>
    %6 = vector.broadcast %3 : vector<1x128xf32> to vector<8x128xf32>
    %7 = arith.addf %5, %6 : vector<8x128xf32>
    %cst_5 = arith.constant 0.000000e+00 : f32
    %8 = vector.broadcast %cst_5 : f32 to vector<8x128xf32>
    %9 = arith.maximumf %7, %8 : vector<8x128xf32>
    %c0_6 = arith.constant 0 : index
    %c0_7 = arith.constant 0 : index
    %10 = vector.load %arg3[%c0_6, %c0_7] : memref<128x128xbf16, #tpu.memory_space<vmem>>, vector<128x128xbf16>
    %11 = vector.extract_strided_slice %0 {offsets = [1, 0], sizes = [1, 128], strides = [1, 1]} : vector<3x128xf32> to vector<1x128xf32>
    %12 = arith.truncf %9 : vector<8x128xf32> to vector<8x128xbf16>
    %cst_8 = arith.constant dense<0.000000e+00> : vector<8x128xf32>
    %13 = tpu.matmul %12, %10, %cst_8 {dimension_numbers = #tpu.dot_dimension_numbers<[1], [0], [0], [1], [0, 0, 1, 1], [], []>} : vector<8x128xbf16>, vector<128x128xbf16>, vector<8x128xf32> -> vector<8x128xf32>
    %14 = vector.broadcast %11 : vector<1x128xf32> to vector<8x128xf32>
    %15 = arith.addf %13, %14 : vector<8x128xf32>
    %cst_9 = arith.constant 0.000000e+00 : f32
    %16 = vector.broadcast %cst_9 : f32 to vector<8x128xf32>
    %17 = arith.maximumf %15, %16 : vector<8x128xf32>
    %c0_10 = arith.constant 0 : index
    %c0_11 = arith.constant 0 : index
    %18 = vector.load %arg4[%c0_10, %c0_11] : memref<128x8xbf16, #tpu.memory_space<vmem>>, vector<128x8xbf16>
    %19 = vector.extract_strided_slice %0 {offsets = [2, 0], sizes = [1, 8], strides = [1, 1]} : vector<3x128xf32> to vector<1x8xf32>
    %20 = arith.truncf %17 : vector<8x128xf32> to vector<8x128xbf16>
    %cst_12 = arith.constant dense<0.000000e+00> : vector<8x8xf32>
    %21 = tpu.matmul %20, %18, %cst_12 {dimension_numbers = #tpu.dot_dimension_numbers<[1], [0], [0], [1], [0, 0, 1, 1], [], []>} : vector<8x128xbf16>, vector<128x8xbf16>, vector<8x8xf32> -> vector<8x8xf32>
    %22 = vector.broadcast %19 : vector<1x8xf32> to vector<8x8xf32>
    %23 = arith.addf %21, %22 : vector<8x8xf32>
    %c0_13 = arith.constant 0 : index
    %c0_14 = arith.constant 0 : index
    %24 = vector.load %arg6[%c0_13, %c0_14] : memref<8x8xf32, #tpu.memory_space<vmem>>, vector<8x8xf32>
    tpu.vector_store %arg6[%c0_13, %c0_14], %23 {strides = array<i32>} : memref<8x8xf32, #tpu.memory_space<vmem>>, vector<8x8xf32>,
    return
  }
  func.func @transform_0(%arg0: i32) -> (i32, i32) {
    %c0_i32 = arith.constant 0 : i32
    %c0_i32_0 = arith.constant 0 : i32
    return %arg0, %c0_i32 : i32, i32
  }
  func.func @transform_1(%arg0: i32) -> (i32, i32) {
    %c0_i32 = arith.constant 0 : i32
    %c0_i32_0 = arith.constant 0 : i32
    %c0_i32_1 = arith.constant 0 : i32
    return %c0_i32, %c0_i32_0 : i32, i32
  }
  func.func @transform_2(%arg0: i32) -> (i32, i32) {
    %c0_i32 = arith.constant 0 : i32
    %c0_i32_0 = arith.constant 0 : i32
    %c0_i32_1 = arith.constant 0 : i32
    return %c0_i32, %c0_i32_0 : i32, i32
  }
  func.func @transform_3(%arg0: i32) -> (i32, i32) {
    %c0_i32 = arith.constant 0 : i32
    %c0_i32_0 = arith.constant 0 : i32
    %c0_i32_1 = arith.constant 0 : i32
    return %c0_i32, %c0_i32_0 : i32, i32
  }
  func.func @transform_4(%arg0: i32) -> (i32, i32) {
    %c0_i32 = arith.constant 0 : i32
    %c0_i32_0 = arith.constant 0 : i32
    %c0_i32_1 = arith.constant 0 : i32
    return %c0_i32, %c0_i32_0 : i32, i32
  }
  func.func @transform_5(%arg0: i32) -> (i32, i32) {
    %c0_i32 = arith.constant 0 : i32
    %c0_i32_0 = arith.constant 0 : i32
    return %arg0, %c0_i32 : i32, i32
  }
}

</mosaic_0001>

<bundles_post_ra>
// kernel: tpu_custom_call.1
= control target key start
LH: loop header
LB: loop body
LE: loop exit
PB: predicated region body
PF: predicated region fallthrough
CT: control target
= control target key end

     0   :  { %10 = vsyncpa [#allocation3], 0  ;;  %s653_s0 = inlined_call_operand.hbm [shape: f32[8,32], index: 0, kind: input, shape index: {}]   ;;  %s654_s1 = inlined_call_operand.hbm [shape: bf16[32,128], index: 1, kind: input, shape index: {}]   ;;  %s655_s2 = inlined_call_operand.vmem [shape: bf16[128,128], index: 2, kind: input, shape index: {}]   ;;  %s656_s3 = inlined_call_operand.vmem [shape: bf16[128,8], index: 3, kind: input, shape index: {}]   ;;  %s657_s4 = inlined_call_operand.vmem [shape: f32[3,128], index: 4, kind: input, shape index: {}]   ;;  %s658_s5 = inlined_call_operand.hbm [shape: f32[8,8], index: 5, kind: output, shape index: {}]  }
   0x1   :  { %11 = vsyncpa [#allocation6], 0 }
   0x2   :  { %12 = vsyncpa [#allocation4], 0  ;;  %s532_s18 = smov [#allocation2]   ;;  %s533_s20 = smov [#allocation5]  }
   0x3   :  { %s19_s19 = sshll.u32 %s532_s18, 4  ;;  %s28_s21 = sshll.u32 %s533_s20, 4  ;;  %s20_s19 = int_to_ptr.vmem [resolvable:$true] %s19_s19  ;;  %s29_s21 = int_to_ptr.vmem [resolvable:$true] %s28_s21 }
   0x4   :  { %s474_s22 = scalar_lea.vmem %s20_s19, 128  ;;  %p479_p1 = scmp.lt.s32.totalorder %s20_s19, %s20_s19 }
   0x5   :  { %p475_p0 = scmp.ne.s32.totalorder %s20_s19, %s474_s22  ;;  %p480_p2 = scmp.lt.s32.totalorder %s474_s22, %s474_s22 }
   0x7   :  { %p481_p3 = por %p480_p2, %p479_p1 }
   0x9   :  { %p482_p4 = pnand %p481_p3, %p475_p0 }
   0xb   :  { %485 = shalt.err (!%p482_p4)
}
   0xc   :  { %22 = dma.hbm_to_vmem [thread:$0]  %s653_s0, 128, %s20_s19, [#allocation3]  }
   0xd   :  { %s494_s25 = scalar_lea.vmem %s29_s21, 256  ;;  %p499_p6 = scmp.lt.s32.totalorder %s29_s21, %s29_s21 }
   0xe   :  { %p495_p5 = scmp.ne.s32.totalorder %s29_s21, %s494_s25  ;;  %p500_p7 = scmp.lt.s32.totalorder %s494_s25, %s494_s25 }
  0x10   :  { %p501_p8 = por %p500_p7, %p499_p6 }
  0x12   :  { %p502_p9 = pnand %p501_p8, %p495_p5 }
  0x14   :  { %505 = shalt.err (!%p502_p9)
}
  0x15   :  { %s534_s26 = smov 64   ;;  %s535_s27 = smov 4  }
  0x16   :  { %34 = dma.hbm_to_vmem [thread:$0]  %s654_s1, 256, %s29_s21, [#allocation6], %s534_s26, %s534_s26, %s535_s27  }
  0x17   :  { %526 = dma.done.wait [#allocation3], 128  }
  0x18   :  { %527 = vsyncadd [#allocation3], 4294967168 }
  0x19   :  { %528 = dma.done.wait [#allocation6], 256  }
  0x1a   :  { %529 = vsyncadd [#allocation6], 4294967040  ;;  %v536_v0 = vmov 0.0   ;;  %vm537_vm0 = vmmov 0   ;;  %v448_v1 = vld [vmem:[#allocation5 + $0x8] sm:$0xff]   ;;  %v449_v2 = vld [vmem:[#allocation5] sm:$0xff]   ;;  %v55_v19 = vlaneseq }
  0x1b   :  { %393 = vmatprep.subr.bf16.mxu0 %v536_v0  ;;  %397 = vmatprep.mubr.msk.bf16.mxu0 %vm537_vm0, %v536_v0  ;;  %v49_v3 = vld [vmem:[#allocation2] sm:$0xff]  ;;  %v450_v4 = vld [vmem:[%s655_s2 + $0x38] sm:$0xff]   ;;  %v451_v6 = vld [vmem:[%s655_s2 + $0x30] sm:$0xff]   ;;  %vm71_vm1 = vcmask 261120   ;;  %vm335_vm2 = vcmask 64512  }
  0x1c   :  { %401 = vmatprep.subr.bf16.mxu1 %v536_v0  ;;  %417 = vmatprep.mubr.msk.bf16.mxu1 %vm537_vm0, %v536_v0  ;;  %v54_v5 = vpack.c.bf16 %v49_v3, %v49_v3  ;;  %v452_v7 = vld [vmem:[%s655_s2 + $0x28] sm:$0xff]   ;;  %v453_v8 = vld [vmem:[%s655_s2 + $0x20] sm:$0xff]   ;;  %v454_v9 = vld [vmem:[%s655_s2 + $0x18] sm:$0xff]   ;;  %v56_v20 = vshrl.u32 %v55_v19, 7 }
  0x1d   :  { %394 = vmatpush3.bf16.msra.mxu0 %v448_v1  ;;  %402 = vmatpush3.bf16.msra.mxu1 %v450_v4  ;;  %v455_v10 = vld [vmem:[%s655_s2 + $0x10] sm:$0xff]   ;;  %v456_v11 = vld [vmem:[%s655_s2 + $0x8] sm:$0xff]   ;;  %v457_v12 = vld [vmem:[%s655_s2] sm:$0xff]  }
  0x1e   :  { %395 = vmatprep.subr.bf16.mxu0 %v536_v0  ;;  %403 = vmatprep.subr.bf16.mxu1 %v536_v0  ;;  %v458_v13 = vld [vmem:[%s656_s3 + $0x38] sm:$0xff]   ;;  %v459_v14 = vld [vmem:[%s656_s3 + $0x30] sm:$0xff]   ;;  %v460_v15 = vld [vmem:[%s656_s3 + $0x28] sm:$0xff]   ;;  %v57_v21 = vsub.s32 0, %v56_v20  ;;  %v135_v33 = vsub.s32 1, %v56_v20  ;;  %v245_v42 = vsub.s32 2, %v56_v20 }
  0x1f   :  { %v461_v16 = vld [vmem:[%s656_s3 + $0x20] sm:$0xff]   ;;  %v462_v17 = vld [vmem:[%s656_s3 + $0x18] sm:$0xff]   ;;  %v463_v18 = vld [vmem:[%s656_s3 + $0x10] sm:$0xff]  }
  0x20   :  { %v48_v22 = vld [vmem:[%s657_s4] sm:$0x7]  ;;  %v464_v31 = vld [vmem:[%s656_s3 + $0x8] sm:$0xff]   ;;  %s538_s4 = smov [#allocation7]  }
  0x21   :  { %396 = vmatpush3.bf16.msra.mxu0 %v449_v2  ;;  %404 = vmatpush3.bf16.msra.mxu1 %v451_v6  ;;  %v58_v23 = vrot.slane %v48_v22, %v57_v21  ;;  %v465_v32 = vld [vmem:[%s656_s3] sm:$0xff]   ;;  %v136_v34 = vrot.slane %v48_v22, %v135_v33  ;;  %v246_v43 = vrot.slane %v48_v22, %v245_v42  ;;  %s343_s9 = sshll.u32 %s538_s4, 4  ;;  %s344_s9 = int_to_ptr.vmem [resolvable:$true] %s343_s9 }
  0x22   :  { %421 = vmatprep.subr.bf16.mxu0 %v536_v0  ;;  %405 = vmatprep.subr.bf16.mxu1 %v536_v0  ;;  %s506_s3 = scalar_lea.vmem %s344_s9, 128  ;;  %p511_p11 = scmp.lt.s32.totalorder %s344_s9, %s344_s9 }
  0x23   :  { %p507_p10 = scmp.ne.s32.totalorder %s344_s9, %s506_s3  ;;  %p512_p12 = scmp.lt.s32.totalorder %s506_s3, %s506_s3 }
  0x24   :  { %398 = vmatmul.mubr.msk.bf16.vlgmr.msra.gmra.mxu0 %vm71_vm1, %v54_v5 }
  0x25   :  { %437 = vmatprep.mubr.msk.bf16.mxu0 %vm537_vm0, %v536_v0  ;;  %406 = vmatpush3.bf16.msra.mxu1 %v452_v7  ;;  %p513_p13 = por %p512_p12, %p511_p11 }
  0x26   :  { %407 = vmatprep.subr.bf16.mxu1 %v536_v0  ;;  %422 = vmatpush3.bf16.msra.mxu0 %v458_v13 }
  0x27   :  { %423 = vmatprep.subr.bf16.mxu0 %v536_v0  ;;  %p514_p0 = pnand %p513_p13, %p507_p10 }
  0x29   :  { %408 = vmatpush3.bf16.msra.mxu1 %v453_v8 }
  0x2a   :  { %409 = vmatprep.subr.bf16.mxu1 %v536_v0  ;;  %424 = vmatpush3.bf16.msra.mxu0 %v459_v14 }
  0x2b   :  { %425 = vmatprep.subr.bf16.mxu0 %v536_v0 }
  0x2d   :  { %410 = vmatpush3.bf16.msra.mxu1 %v454_v9 }
  0x2e   :  { %411 = vmatprep.subr.bf16.mxu1 %v536_v0  ;;  %426 = vmatpush3.bf16.msra.mxu0 %v460_v15 }
  0x2f   :  { %427 = vmatprep.subr.bf16.mxu0 %v536_v0 }
  0x31   :  { %412 = vmatpush3.bf16.msra.mxu1 %v455_v10 }
  0x32   :  { %413 = vmatprep.subr.bf16.mxu1 %v536_v0  ;;  %428 = vmatpush3.bf16.msra.mxu0 %v461_v16 }
  0x33   :  { %429 = vmatprep.subr.bf16.mxu0 %v536_v0 }
  0x35   :  { %414 = vmatpush3.bf16.msra.mxu1 %v456_v11 }
  0x36   :  { %415 = vmatprep.subr.bf16.mxu1 %v536_v0  ;;  %430 = vmatpush3.bf16.msra.mxu0 %v462_v17 }
  0x37   :  { %431 = vmatprep.subr.bf16.mxu0 %v536_v0 }
  0x39   :  { %416 = vmatpush3.bf16.msra.mxu1 %v457_v12 }
  0x3a   :  { %432 = vmatpush3.bf16.msra.mxu0 %v463_v18 }
  0x3b   :  { %433 = vmatprep.subr.bf16.mxu0 %v536_v0 }
  0x3e   :  { %434 = vmatpush3.bf16.msra.mxu0 %v464_v31 }
  0x3f   :  { %435 = vmatprep.subr.bf16.mxu0 %v536_v0 }
  0x42   :  { %436 = vmatpush3.bf16.msra.mxu0 %v465_v32 }
  0xe4   :  { %v109_v24 = vpop.f32.mrf.mxu0 }
  0xe5   :  { %v110_v25 = vadd.f32 %v109_v24, %v58_v23 }
  0xe6   :  { %v399_v26 = vpop.f32.mrf.mxu0 }
  0xe7   :  { %v115_v27 = vmax.f32 %v110_v25, 0.0 }
  0xe8   :  { %v112_v28 = vpop.f32.mrf.mxu0 }
  0xe9   :  { %v132_v29 = vpack.c.bf16 %v115_v27, %v115_v27 }
  0xea   :  { %v400_v30 = vpop.f32.mrf.mxu0 }
  0xeb   :  { %418 = vmatmul.mubr.bf16.vlgmr.msra.gmra.mxu1 %v132_v29 }
 0x1ab   :  { %v219_v35 = vpop.f32.mrf.mxu1 }
 0x1ac   :  { %v220_v36 = vadd.f32 %v219_v35, %v136_v34 }
 0x1ad   :  { %v419_v37 = vpop.f32.mrf.mxu1 }
 0x1ae   :  { %v225_v38 = vmax.f32 %v220_v36, 0.0 }
 0x1af   :  { %v222_v39 = vpop.f32.mrf.mxu1 }
 0x1b0   :  { %v242_v40 = vpack.c.bf16 %v225_v38, %v225_v38 }
 0x1b1   :  { %v420_v41 = vpop.f32.mrf.mxu1 }
 0x1b2   :  { %438 = vmatmul.mubr.bf16.vlgmr.msra.gmra.mxu0 %v242_v40 }
 0x272   :  { %v329_v44 = vpop.f32.mrf.mxu0 }
 0x273   :  { %v330_v45 = vadd.f32 %v329_v44, %v246_v43 }
 0x274   :  { %v439_v46 = vpop.f32.mrf.mxu0 }
 0x275   :  { %336 = vst.msk [vmem:[#allocation7] sm:$0xff] %vm335_vm2, %v330_v45 }
 0x276   :  { %v332_v47 = vpop.f32.mrf.mxu0 }
 0x277   :  { %517 = shalt.err (!%p514_p0)
}
 0x278   :  { %346 = dma.vmem_to_hbm [thread:$0]  %s344_s9, 128, %s658_s5, [#allocation4]   ;;  %v440_v48 = vpop.f32.mrf.mxu0 }
 0x279   :  { %530 = dma.done.wait [#allocation4], 128  }
 0x27a   :  { %531 = vsyncadd [#allocation4], 4294967168 }
 0x27b   :  { %350 = vsyncpa [#allocation3], 1 }
 0x27c   :  { %351 = vsyncpa [#allocation6], 1 }
 0x27d   :  { %352 = vsyncpa [#allocation4], 1 }

</bundles_post_ra>
